<compile_context>
chip_gen: v6e
topology: v6e:2x2x1
jax: 0.10.0
libtpu: 0.0.40
codegen_flags: <defaults>
</compile_context>

<pallas_src>
import jax
import jax.numpy as jnp
import numpy as np
from jax.experimental import pallas as pl
from jax.experimental.pallas import tpu as pltpu


def _graph_emb_kernel(h_ref, batch_ref, wcat_ref, bf_ref, bg_ref,
                      out_ref, acc_ref):
    sdim = bf_ref.shape[1]
    num_graphs = acc_ref.shape[0]
    step = pl.program_id(1)

    @pl.when(step == 0)
    def _():
        acc_ref[...] = jnp.zeros_like(acc_ref)

    h = h_ref[...]                                                     # [T, D_in]

    # Fused f_m / g_m linear: one MXU pass; gate logit is the last column.
    z = jnp.dot(h, wcat_ref[...], preferred_element_type=jnp.float32)  # [T, S+1]
    g = jax.nn.sigmoid(z[:, sdim:sdim + 1] + bg_ref[...])              # [T, 1]
    h_g = (z[:, :sdim] + bf_ref[...]) * g                              # [T, S]

    # Transposed one-hot segment sum: [G, T] @ [T, S] on the MXU.
    # Padded rows carry batch id -1 -> no match -> zero contribution.
    gid = jax.lax.broadcasted_iota(jnp.int32, (num_graphs, 1), 0)      # [G, 1]
    one_hot = (batch_ref[...] == gid).astype(jnp.float32)              # [G, T]
    acc_ref[...] += jnp.dot(one_hot, h_g,
                            preferred_element_type=jnp.float32)        # [G, S]

    @pl.when(step == pl.num_programs(1) - 1)
    def _():
        out_ref[0] = acc_ref[...]


def graph_emb_gsum(h, batch, w_f, b_f, w_g, b_g, num_graphs,
                   *, tile_n=2048, num_shards=1):
    """h: [N, D_in] f32; batch: [N] int32 graph ids in [0, num_graphs)."""
    n, d_in = h.shape
    sdim = w_f.shape[1]

    # Tile size: keep the lane axis of the [1, TILE_N] batch block 128-aligned.
    tile_n = max(128, (min(tile_n, max(n, 1)) + 127) // 128 * 128)
    tiles_total = pl.cdiv(n, tile_n)
    tiles_per_shard = pl.cdiv(tiles_total, num_shards)
    n_pad = num_shards * tiles_per_shard * tile_n
    pad = n_pad - n

    h_p = jnp.pad(h.astype(jnp.float32), ((0, pad), (0, 0)))
    batch_p = jnp.pad(batch.astype(jnp.int32), ((0, pad),),
                      constant_values=-1).reshape(1, n_pad)

    # Fused weight for the single-pass matmul.
    w_cat = jnp.concatenate([w_f, w_g], axis=1).astype(jnp.float32)    # [D_in, S+1]
    bf2 = b_f.reshape(1, sdim).astype(jnp.float32)
    bg2 = b_g.reshape(1, 1).astype(jnp.float32)

    # Advisory cost hint for XLA scheduling around the custom call.
    cost = pl.CostEstimate(
        flops=2 * n_pad * (d_in * (sdim + 1) + num_graphs * sdim),
        transcendentals=n_pad,
        bytes_accessed=(h_p.size + w_cat.size + num_shards * num_graphs * sdim) * 4
                       + batch_p.size * 4,
    )

    tps = tiles_per_shard
    partials = pl.pallas_call(
        _graph_emb_kernel,
        out_shape=jax.ShapeDtypeStruct((num_shards, num_graphs, sdim),
                                       jnp.float32),
        grid=(num_shards, tiles_per_shard),
        in_specs=[
            pl.BlockSpec((tile_n, d_in), lambda s, i: (s * tps + i, 0)),   # h
            pl.BlockSpec((1, tile_n), lambda s, i: (0, s * tps + i)),      # batch
            pl.BlockSpec((d_in, sdim + 1), lambda s, i: (0, 0)),           # w_cat
            pl.BlockSpec((1, sdim), lambda s, i: (0, 0)),                  # b_f
            pl.BlockSpec((1, 1), lambda s, i: (0, 0)),                     # b_g
        ],
        out_specs=pl.BlockSpec((1, num_graphs, sdim), lambda s, i: (s, 0, 0)),
        scratch_shapes=[pltpu.VMEM((num_graphs, sdim), jnp.float32)],
        compiler_params=pltpu.CompilerParams(
            dimension_semantics=("parallel", "arbitrary")),
        cost_estimate=cost,
    )(h_p, batch_p, w_cat, bf2, bg2)

    # Tiny cross-shard (cross-TensorCore on v7x) partial-sum reduction.
    return partials.sum(axis=0)


def graph_emb_reference(h, batch, w_f, b_f, w_g, b_g, num_graphs):
    h_vg = h @ w_f + b_f
    g = jax.nn.sigmoid(h @ w_g + b_g)
    return jax.ops.segment_sum(h_vg * g, batch, num_segments=num_graphs)


if __name__ == "__main__":
    # Module hyperparameters: D_in = ndim + 5
    ndim, sdim = 27, 32
    d_in = ndim + 5                       # 32
    n_nodes, num_graphs = 600, 8          # exercises tiling, tail mask, shards

    key = jax.random.PRNGKey(0)
    k_h, k_b, k_wf, k_bf, k_wg, k_bg = jax.random.split(key, 6)

    # Deterministic parameter init (PyTorch Linear default: U(-1/sqrt(fan_in), .))
    bound = 1.0 / np.sqrt(d_in)
    w_f = jax.random.uniform(k_wf, (d_in, sdim), jnp.float32, -bound, bound)
    b_f = jax.random.uniform(k_bf, (sdim,), jnp.float32, -bound, bound)
    w_g = jax.random.uniform(k_wg, (d_in, 1), jnp.float32, -bound, bound)
    b_g = jax.random.uniform(k_bg, (1,), jnp.float32, -bound, bound)

    h = jax.random.normal(k_h, (n_nodes, d_in), jnp.float32)
    batch = jax.random.randint(k_b, (n_nodes,), 0, num_graphs, jnp.int32)

    out = graph_emb_gsum(h, batch, w_f, b_f, w_g, b_g, num_graphs,
                         tile_n=128, num_shards=2)
    out = jax.block_until_ready(out)

    ref = graph_emb_reference(h, batch, w_f, b_f, w_g, b_g, num_graphs)
    np.testing.assert_allclose(np.asarray(out), np.asarray(ref),
                               rtol=1e-5, atol=1e-4)

    print("KERNEL_OK")
</pallas_src>

<mosaic_0001>
module attributes {stable_mosaic.version = 11 : i64} {
  func.func @_graph_emb_kernel(%arg0: i32, %arg1: i32, %arg2: memref<128x32xf32, #tpu.memory_space<vmem>>, %arg3: memref<1x128xi32, #tpu.memory_space<vmem>>, %arg4: memref<32x33xf32, #tpu.memory_space<vmem>>, %arg5: memref<1x32xf32, #tpu.memory_space<vmem>>, %arg6: memref<1x1xf32, #tpu.memory_space<vmem>>, %arg7: memref<1x8x32xf32, #tpu.memory_space<vmem>>, %arg8: memref<8x32xf32, #tpu.memory_space<vmem>>) attributes {dimension_semantics = [#tpu.dimension_semantics<parallel>, #tpu.dimension_semantics<arbitrary>], iteration_bounds = array<i64: 2, 3>, scalar_prefetch = 0 : i64, scratch_operands = 1 : i64, tpu.core_type = #tpu.core_type<tc>, window_params = [{transform_indices = @transform_0, window_bounds = array<i64: 128, 32>}, {transform_indices = @transform_1, window_bounds = array<i64: 1, 128>}, {pipeline_mode = #tpu.pipeline_mode<synchronous>, transform_indices = @transform_2, window_bounds = array<i64: 32, 33>}, {pipeline_mode = #tpu.pipeline_mode<synchronous>, transform_indices = @transform_3, window_bounds = array<i64: 1, 32>}, {pipeline_mode = #tpu.pipeline_mode<synchronous>, transform_indices = @transform_4, window_bounds = array<i64: 1, 1>}, {transform_indices = @transform_5, window_bounds = array<i64: 1, 8, 32>}]} {
    %c0_i32 = arith.constant 0 : i32
    %0 = arith.cmpi eq, %arg1, %c0_i32 : i32
    %1 = arith.extui %0 : i1 to i32
    %c0_i32_0 = arith.constant 0 : i32
    %2 = arith.cmpi ne, %1, %c0_i32_0 : i32
    scf.if %2 {
      %cst_17 = arith.constant 0.000000e+00 : f32
      %35 = vector.broadcast %cst_17 : f32 to vector<8x32xf32>
      %c0_18 = arith.constant 0 : index
      %c0_19 = arith.constant 0 : index
      %36 = vector.load %arg8[%c0_18, %c0_19] : memref<8x32xf32, #tpu.memory_space<vmem>>, vector<8x32xf32>
      tpu.vector_store %arg8[%c0_18, %c0_19], %35 {strides = array<i32>} : memref<8x32xf32, #tpu.memory_space<vmem>>, vector<8x32xf32>,
    } else {
    }
    %c0 = arith.constant 0 : index
    %c0_1 = arith.constant 0 : index
    %3 = vector.load %arg2[%c0, %c0_1] : memref<128x32xf32, #tpu.memory_space<vmem>>, vector<128x32xf32>
    %c0_2 = arith.constant 0 : index
    %c0_3 = arith.constant 0 : index
    %4 = vector.load %arg4[%c0_2, %c0_3] : memref<32x33xf32, #tpu.memory_space<vmem>>, vector<32x33xf32>
    %cst = arith.constant dense<0.000000e+00> : vector<128x33xf32>
    %5 = tpu.matmul %3, %4, %cst {dimension_numbers = #tpu.dot_dimension_numbers<[1], [0], [0], [1], [0, 0, 1, 1], [], []>} : vector<128x32xf32>, vector<32x33xf32>, vector<128x33xf32> -> vector<128x33xf32>
    %6 = vector.extract_strided_slice %5 {offsets = [0, 32], sizes = [128, 1], strides = [1, 1]} : vector<128x33xf32> to vector<128x1xf32>
    %c0_4 = arith.constant 0 : index
    %c0_5 = arith.constant 0 : index
    %7 = vector.load %arg6[%c0_4, %c0_5] : memref<1x1xf32, #tpu.memory_space<vmem>>, vector<1x1xf32>
    %8 = vector.broadcast %7 : vector<1x1xf32> to vector<128x1xf32>
    %9 = arith.addf %6, %8 : vector<128x1xf32>
    %10 = arith.negf %9 : vector<128x1xf32>
    %11 = math.exp %10 : vector<128x1xf32>
    %cst_6 = arith.constant 1.000000e+00 : f32
    %12 = vector.broadcast %cst_6 : f32 to vector<128x1xf32>
    %13 = arith.addf %12, %11 : vector<128x1xf32>
    %14 = arith.divf %12, %13 : vector<128x1xf32>
    %15 = vector.extract_strided_slice %5 {offsets = [0, 0], sizes = [128, 32], strides = [1, 1]} : vector<128x33xf32> to vector<128x32xf32>
    %c0_7 = arith.constant 0 : index
    %c0_8 = arith.constant 0 : index
    %16 = vector.load %arg5[%c0_7, %c0_8] : memref<1x32xf32, #tpu.memory_space<vmem>>, vector<1x32xf32>
    %17 = vector.broadcast %16 : vector<1x32xf32> to vector<128x32xf32>
    %18 = arith.addf %15, %17 : vector<128x32xf32>
    %19 = vector.broadcast %14 : vector<128x1xf32> to vector<128x32xf32>
    %20 = arith.mulf %18, %19 : vector<128x32xf32>
    %21 = tpu.iota {dimensions = array<i32: 0>} : vector<8x1xi32>
    %c0_9 = arith.constant 0 : index
    %c0_10 = arith.constant 0 : index
    %22 = vector.load %arg3[%c0_9, %c0_10] : memref<1x128xi32, #tpu.memory_space<vmem>>, vector<1x128xi32>
    %23 = vector.broadcast %22 : vector<1x128xi32> to vector<8x128xi32>
    %24 = vector.broadcast %21 : vector<8x1xi32> to vector<8x128xi32>
    %25 = arith.cmpi eq, %23, %24 : vector<8x128xi32>
    %26 = arith.extui %25 : vector<8x128xi1> to vector<8x128xi32>
    %27 = arith.sitofp %26 : vector<8x128xi32> to vector<8x128xf32>
    %c0_11 = arith.constant 0 : index
    %c0_12 = arith.constant 0 : index
    %28 = vector.load %arg8[%c0_11, %c0_12] : memref<8x32xf32, #tpu.memory_space<vmem>>, vector<8x32xf32>
    %cst_13 = arith.constant dense<0.000000e+00> : vector<8x32xf32>
    %29 = tpu.matmul %27, %20, %cst_13 {dimension_numbers = #tpu.dot_dimension_numbers<[1], [0], [0], [1], [0, 0, 1, 1], [], []>} : vector<8x128xf32>, vector<128x32xf32>, vector<8x32xf32> -> vector<8x32xf32>
    %30 = arith.addf %28, %29 : vector<8x32xf32>
    %c0_14 = arith.constant 0 : index
    %c0_15 = arith.constant 0 : index
    %31 = vector.load %arg8[%c0_14, %c0_15] : memref<8x32xf32, #tpu.memory_space<vmem>>, vector<8x32xf32>
    tpu.vector_store %arg8[%c0_14, %c0_15], %30 {strides = array<i32>} : memref<8x32xf32, #tpu.memory_space<vmem>>, vector<8x32xf32>,
    %c2_i32 = arith.constant 2 : i32
    %32 = arith.cmpi eq, %arg1, %c2_i32 : i32
    %33 = arith.extui %32 : i1 to i32
    %c0_i32_16 = arith.constant 0 : i32
    %34 = arith.cmpi ne, %33, %c0_i32_16 : i32
    scf.if %34 {
      %c0_17 = arith.constant 0 : index
      %c0_18 = arith.constant 0 : index
      %35 = vector.load %arg8[%c0_17, %c0_18] : memref<8x32xf32, #tpu.memory_space<vmem>>, vector<8x32xf32>
      %c0_19 = arith.constant 0 : index
      %c0_20 = arith.constant 0 : index
      %c0_21 = arith.constant 0 : index
      %36 = vector.load %arg7[%c0_19, %c0_20, %c0_21] : memref<1x8x32xf32, #tpu.memory_space<vmem>>, vector<1x8x32xf32>
      %37 = vector.shape_cast %36 : vector<1x8x32xf32> to vector<8x32xf32>
      %38 = vector.shape_cast %35 : vector<8x32xf32> to vector<1x8x32xf32>
      tpu.vector_store %arg7[%c0_19, %c0_20, %c0_21], %38 {strides = array<i32>} : memref<1x8x32xf32, #tpu.memory_space<vmem>>, vector<1x8x32xf32>,
    } else {
    }
    return
  }
  func.func @transform_0(%arg0: i32, %arg1: i32) -> (i32, i32) {
    %c3_i32 = arith.constant 3 : i32
    %0 = arith.muli %arg0, %c3_i32 : i32
    %1 = arith.addi %0, %arg1 : i32
    %c0_i32 = arith.constant 0 : i32
    %c0_i32_0 = arith.constant 0 : i32
    return %1, %c0_i32 : i32, i32
  }
  func.func @transform_1(%arg0: i32, %arg1: i32) -> (i32, i32) {
    %c3_i32 = arith.constant 3 : i32
    %0 = arith.muli %arg0, %c3_i32 : i32
    %1 = arith.addi %0, %arg1 : i32
    %c0_i32 = arith.constant 0 : i32
    %c0_i32_0 = arith.constant 0 : i32
    return %c0_i32, %1 : i32, i32
  }
  func.func @transform_2(%arg0: i32, %arg1: i32) -> (i32, i32) {
    %c0_i32 = arith.constant 0 : i32
    %c0_i32_0 = arith.constant 0 : i32
    %c0_i32_1 = arith.constant 0 : i32
    return %c0_i32, %c0_i32_0 : i32, i32
  }
  func.func @transform_3(%arg0: i32, %arg1: i32) -> (i32, i32) {
    %c0_i32 = arith.constant 0 : i32
    %c0_i32_0 = arith.constant 0 : i32
    %c0_i32_1 = arith.constant 0 : i32
    return %c0_i32, %c0_i32_0 : i32, i32
  }
  func.func @transform_4(%arg0: i32, %arg1: i32) -> (i32, i32) {
    %c0_i32 = arith.constant 0 : i32
    %c0_i32_0 = arith.constant 0 : i32
    %c0_i32_1 = arith.constant 0 : i32
    return %c0_i32, %c0_i32_0 : i32, i32
  }
  func.func @transform_5(%arg0: i32, %arg1: i32) -> (i32, i32, i32) {
    %c0_i32 = arith.constant 0 : i32
    %c0_i32_0 = arith.constant 0 : i32
    %c0_i32_1 = arith.constant 0 : i32
    return %arg0, %c0_i32, %c0_i32_0 : i32, i32, i32
  }
}

</mosaic_0001>

<bundles_post_ra>
// kernel: tpu_custom_call.1
= control target key start
LH: loop header
LB: loop body
LE: loop exit
PB: predicated region body
PF: predicated region fallthrough
CT: control target
= control target key end

     0   :  { %s1648_s0 = inlined_call_operand.vmem [shape: f32[768,32], index: 0, kind: input, shape index: {}]   ;;  %s1649_s1 = inlined_call_operand.vmem [shape: s32[1,768], index: 1, kind: input, shape index: {}]   ;;  %s1650_s2 = inlined_call_operand.vmem [shape: f32[32,33], index: 2, kind: input, shape index: {}]   ;;  %s1651_s3 = inlined_call_operand.vmem [shape: f32[1,32], index: 3, kind: input, shape index: {}]   ;;  %s1652_s4 = inlined_call_operand.<no memory space> [shape: f32[1,1], index: 4, kind: input, shape index: {}]   ;;  %s1653_s5 = inlined_call_operand.hbm [shape: f32[2,8,32], index: 5, kind: output, shape index: {}]  }
   0x1   :  { %v10_v0 = vstv %s1652_s4 }
   0x2   :  { %11 = vst [vmem:[#allocation3] sm:$0x1] %v10_v0 }
   0x3   :  { %12 = vsyncpa [#allocation5], 0 }
   0x4   :  { %14 = vsyncpa [#allocation5 + $0x1], 0  ;;  %s1355_s20 = smov 0   ;;  %s1357_s21 = smov 0  }
   0x5   :  { %s1359_s22 = smov 0   ;;  %s1361_s23 = smov 0  }
   0x6   :  { %s1363_s24 = smov 0   ;;  %s1365_s25 = smov 0  }
   0x7   :  { %s1367_s26 = smov 0   ;;  %s1369_s27 = smov 0  }
   0x8 LB: > { %s923_s4 = sadd.s32 4294967295, %s1313_s27   ;;  %s924_s28 = sadd.s32 4294967294, %s1313_s27   ;;  %s1313_s27 = sphi %s1369_s27, %s20_s27   ;;  %s1309_s26 = sphi %s1367_s26, %s1664_s26   ;;  %s1305_s25 = sphi %s1365_s25, %s1663_s25   ;;  %s1301_s24 = sphi %s1363_s24, %s1662_s24   ;;  %s1297_s23 = sphi %s1361_s23, %s1661_s23   ;;  %s1293_s22 = sphi %s1359_s22, %s1660_s22   ;;  %s1289_s21 = sphi %s1357_s21, %s1659_s21   ;;  %s1285_s20 = sphi %s1355_s20, %s1658_s20  }
   0x9   : > { %s29_s29 = sadd.s32 1, %s1305_s25  ;;  %s32_s30 = sadd.s32 1, %s1309_s26 }
   0xa   : > { %p30_p0 = scmp.ge.s32.totalorder %s29_s29, 3  ;;  %p172_p1 = scmp.ne.s32.totalorder %s1293_s22, %s1289_s21 }
   0xb   : > { %p173_p2 = scmp.eq.s32.totalorder %s923_s4, 5  ;;  %p178_p4 = scmp.ne.s32.totalorder %s1289_s21, %s1285_s20 }
   0xc   : > { %s1666_s29 = smov (%p30_p0, %s29_s29), 0  ;;  %s1668_s30 = smov (!%p30_p0, %s32_s30), %s1309_s26 }
   0xd   : > { %p1404_p3 = por %p173_p2, %p172_p1  ;;  %p34_p5 = scmp.ge.s32.totalorder %s1668_s30, 2 }
   0xe   : > { %p179_p6 = scmp.eq.s32.totalorder %s924_s28, 5  ;;  %p927_p7 = scmp.ge.s32.totalorder %s1313_s27, 1 }
   0xf   : > { %p229_p8 = scmp.lt.s32.totalorder %s1313_s27, 7  ;;  %s1670_s30 = smov (%p34_p5, %s1668_s30), 0 }
  0x10   : > { %p1414_p9 = por %p179_p6, %p178_p4  ;;  %s159_s8 = ssub.s32 %s1309_s26, %s1670_s30 }
  0x11   : > { %p230_p10 = pnand %p927_p7, %p229_p8  ;;  %s162_s9 = sadd.s32 1, %s1293_s22 }
  0x12   : > { %p160_p11 = scmp.eq.s32.totalorder %s159_s8, 0  ;;  %s1654_s11 = sand.u32 (!%p230_p10), 1, %s1289_s21  }
  0x13   : > { %233 = sbr.rel (%p230_p10) target bundleno = 681 (0x2a9), region = 40  ;;  %s1428_s13 = sshll.u32 (!%p230_p10), %s1654_s11, 3 }
  0x14   : > { %s1422_s10 = scalar_select %p160_p11, %s1293_s22, %s162_s9  }
  0x15   : > { %s264_s12 = smul.u32 (!%p230_p10), 3, %s1301_s24  ;;  %s263_s9 = scalar_lea.vmem (!%p230_p10), [#allocation4], %s1428_s13 }
  0x16   : > { %p931_p0 = scmp.ne.s32.totalorder (!%p230_p10), %s1297_s23, 0 }
  0x17   : > { %s265_s14 = sadd.s32 (!%p230_p10), %s1297_s23, %s264_s12 }
  0x18   : > { %s929_s15 = sshll.u32 %s265_s14, 4  ;;  %p276_p12 = scmp.lt.s32.totalorder %s265_s14, 5 }
  0x19   : > { %p267_p13 = scmp.lt.s32.totalorder %s929_s15, 95  ;;  %284 = sbr.rel (%p931_p0) target bundleno = 32 (0x20), region = 44 }
  0x1a   : > { %s1672_s14 = smov (!%p276_p12, %s265_s14), 5 }
  0x1b   : > { %s1674_s15 = smov (!%p267_p13, %s929_s15), 95  ;;  %s278_s18 = scalar_lea.vmem %s1649_s1, %s1672_s14 }
  0x1c   : > { %s930_s19 = sshll.u32 %s1674_s15, 3 }
  0x1d   : > { %s1440_s8 = scalar_lea.vmem %s1648_s0, %s930_s19 }
  0x1e   : > { %vm285_vm0 = vcmask 261120   ;;  %v1315_v1 = vmov 0.0  }
  0x1f   : > { %286 = vst.msk [vmem:[#allocation2] sm:$0xff] %vm285_vm0, %v1315_v1 }
  0x20 PF: > { %v306_v2 = vld [vmem:[%s1650_s2 + $0x18] sm:$0xff]  ;;  %v305_v3 = vld [vmem:[%s1650_s2 + $0x10] sm:$0xff]  ;;  %vm307_vm1 = vcmask 261120   ;;  %v287_v4 = vld [vmem:[%s1440_s8] sm:$0xff]  ;;  %s1316_s28 = smov 32   ;;  %v1317_v23 = vmov 32  }
  0x21   : > { %1011 = vmatprep.subr.mxu0 %v306_v2  ;;  %v304_v5 = vld [vmem:[%s1650_s2 + $0x8] sm:$0xff]  ;;  %1019 = vmatprep.mubr.msk.f32.mxu0 %vm307_vm1, %v287_v4  ;;  %v303_v6 = vld [vmem:[%s1650_s2] sm:$0xff]  ;;  %v289_v9 = vld [vmem:[%s1440_s8 + $0x10] sm:$0xff]  ;;  %vm1319_vm2 = vmmov 0   ;;  %p969_p1 = scmp.ne.s32.totalorder %s1297_s23, 2 }
  0x22   : > { %1012 = vmatpush3.msra.mxu0 %v306_v2  ;;  %v288_v7 = vld [vmem:[%s1440_s8 + $0x8] sm:$0xff]  ;;  %v290_v10 = vld [vmem:[%s1440_s8 + $0x18] sm:$0xff]  ;;  %v291_v11 = vld [vmem:[%s1440_s8 + $0x20] sm:$0xff]  ;;  %1156 = vset.pattern.permute.xlu1 %v1317_v23 }
  0x23   : > { %1013 = vmatprep.subr.mxu0 %v305_v3  ;;  %v948_v8 = vld [vmem:[#allocation3] ss:$0 sm:$0xff]  ;;  %v293_v13 = vld [vmem:[%s1440_s8 + $0x30] sm:$0xff]  ;;  %v294_v14 = vld [vmem:[%s1440_s8 + $0x38] sm:$0xff]  ;;  %1155 = vset.pattern.permute.xlu0 %v1317_v23 }
  0x24   : > { %1014 = vmatpush3.msra.mxu0 %v305_v3  ;;  %507 = vrot.lane.b32.xlu0 %v948_v8, %s1316_s28  ;;  %v292_v12 = vld [vmem:[%s1440_s8 + $0x28] sm:$0xff]  ;;  %v295_v15 = vld [vmem:[%s1440_s8 + $0x40] sm:$0xff]  ;;  %v297_v17 = vld [vmem:[%s1440_s8 + $0x50] sm:$0xff] }
  0x25   : > { %1015 = vmatprep.subr.mxu0 %v304_v5  ;;  %v296_v16 = vld [vmem:[%s1440_s8 + $0x48] sm:$0xff]  ;;  %v298_v18 = vld [vmem:[%s1440_s8 + $0x58] sm:$0xff]  ;;  %v299_v19 = vld [vmem:[%s1440_s8 + $0x60] sm:$0xff] }
  0x26   : > { %1016 = vmatpush3.msra.mxu0 %v304_v5  ;;  %v300_v20 = vld [vmem:[%s1440_s8 + $0x68] sm:$0xff]  ;;  %v301_v21 = vld [vmem:[%s1440_s8 + $0x70] sm:$0xff]  ;;  %v302_v22 = vld [vmem:[%s1440_s8 + $0x78] sm:$0xff] }
  0x27   : > { %1017 = vmatprep.subr.mxu0 %v303_v6 }
  0x28   : > { %1018 = vmatpush3.msra.mxu0 %v303_v6 }
  0x29   : > { %1020 = vmatmul.mubr.msk.f32.vlgmr.msra.gmra.mxu0 %vm307_vm1, %v288_v7 }
  0x2a   : > { %1022 = vmatprep.mubr.msk.f32.mxu0 %vm307_vm1, %v289_v9 }
  0x2d   : > { %1023 = vmatmul.mubr.msk.f32.gmra.mxu0 %vm307_vm1, %v290_v10 }
  0x2e   : > { %1025 = vmatprep.mubr.msk.f32.mxu0 %vm307_vm1, %v291_v11 }
  0x31   : > { %1026 = vmatmul.mubr.msk.f32.gmra.mxu0 %vm307_vm1, %v292_v12 }
  0x32   : > { %1028 = vmatprep.mubr.msk.f32.mxu0 %vm307_vm1, %v293_v13 }
  0x35   : > { %1029 = vmatmul.mubr.msk.f32.gmra.mxu0 %vm307_vm1, %v294_v14 }
  0x36   : > { %1031 = vmatprep.mubr.msk.f32.mxu0 %vm307_vm1, %v295_v15 }
  0x39   : > { %1032 = vmatmul.mubr.msk.f32.gmra.mxu0 %vm307_vm1, %v296_v16 }
  0x3a   : > { %1034 = vmatprep.mubr.msk.f32.mxu0 %vm307_vm1, %v297_v17 }
  0x3d   : > { %1035 = vmatmul.mubr.msk.f32.gmra.mxu0 %vm307_vm1, %v298_v18 }
  0x3e   : > { %1037 = vmatprep.mubr.msk.f32.mxu0 %vm307_vm1, %v299_v19 }
  0x41   : > { %1038 = vmatmul.mubr.msk.f32.gmra.mxu0 %vm307_vm1, %v300_v20 }
  0x42   : > { %1040 = vmatprep.mubr.msk.f32.mxu0 %vm307_vm1, %v301_v21 }
  0x45   : > { %1041 = vmatmul.mubr.msk.f32.gmra.mxu0 %vm307_vm1, %v302_v22 }
  0x96   : > { %v508_v36 = vpop.permute.xlu0 %507 }
  0xe9   : > { %v1488_v24 = vpop.f32.mrf.mxu0 }
  0xea   : > { %v511_v3 = vadd.f32 %v1488_v24, %v508_v36 }
  0xeb   : > { %v1490_v25 = vpop.f32.mrf.mxu0 }
  0xec   : > { %v950_v12 = vmul.f32 -1.442695, %v511_v3  ;;  %v510_v16 = vadd.f32 %v508_v36, %v1490_v25 }
  0xed   : > { %v1492_v26 = vpop.f32.mrf.mxu0 }
  0xee   : > { %v513_v61 = vadd.f32 %v1492_v26, %v508_v36  ;;  %v949_v22 = vmul.f32 -1.442695, %v510_v16 }
  0xef   : > { %v1494_v27 = vpop.f32.mrf.mxu0 }
  0xf0   : > { %v952_v4 = vmul.f32 -1.442695, %v513_v61  ;;  %v512_v7 = vadd.f32 %v508_v36, %v1494_v27 }
  0xf1   : > { %v1496_v28 = vpop.f32.mrf.mxu0 }
  0xf2   : > { %v515_v57 = vadd.f32 %v1496_v28, %v508_v36  ;;  %v951_v17 = vmul.f32 -1.442695, %v512_v7 }
  0xf3   : > { %v1498_v29 = vpop.f32.mrf.mxu0 }
  0xf4   : > { %v954_v62 = vmul.f32 -1.442695, %v515_v57  ;;  %v514_v0 = vadd.f32 %v508_v36, %v1498_v29 }
  0xf5   : > { %v1500_v30 = vpop.f32.mrf.mxu0 }
  0xf6   : > { %v517_v53 = vadd.f32 %v1500_v30, %v508_v36  ;;  %v953_v8 = vmul.f32 -1.442695, %v514_v0 }
  0xf7   : > { %v1502_v31 = vpop.f32.mrf.mxu0 }
  0xf8   : > { %v956_v58 = vmul.f32 -1.442695, %v517_v53  ;;  %v516_v59 = vadd.f32 %v508_v36, %v1502_v31 }
  0xf9   : > { %v1504_v32 = vpop.f32.mrf.mxu0 }
  0xfa   : > { %v519_v46 = vadd.f32 %v1504_v32, %v508_v36  ;;  %v955_v1 = vmul.f32 -1.442695, %v516_v59 }
  0xfb   : > { %v1506_v33 = vpop.f32.mrf.mxu0 }
  0xfc   : > { %v958_v54 = vmul.f32 -1.442695, %v519_v46  ;;  %v518_v55 = vadd.f32 %v508_v36, %v1506_v33 }
  0xfd   : > { %v1508_v34 = vpop.f32.mrf.mxu0 }
  0xfe   : > { %v521_v38 = vadd.f32 %v1508_v34, %v508_v36  ;;  %v957_v60 = vmul.f32 -1.442695, %v518_v55 }
  0xff   : > { %v1510_v35 = vpop.f32.mrf.mxu0 }
 0x100   : > { %v960_v44 = vmul.f32 -1.442695, %v521_v38  ;;  %v520_v51 = vadd.f32 %v508_v36, %v1510_v35 }
 0x101   : > { %v1512_v37 = vpop.f32.mrf.mxu0 }
 0x102   : > { %v523_v39 = vadd.f32 %v1512_v37, %v508_v36  ;;  %v959_v56 = vmul.f32 -1.442695, %v520_v51 }
 0x103   : > { %v1516_v40 = vpop.f32.mrf.mxu0 }
 0x104   : > { %v962_v41 = vmul.f32 -1.442695, %v523_v39  ;;  %v522_v42 = vadd.f32 %v508_v36, %v1516_v40 }
 0x105   : > { %v1519_v43 = vpop.f32.mrf.mxu0 }
 0x106   : > { %v525_v45 = vadd.f32 %v1519_v43, %v508_v36  ;;  %1157 = vpow2.f32 %v962_v41  ;;  %v961_v48 = vmul.f32 -1.442695, %v522_v42 }
 0x107   : > { %v1523_v47 = vpop.f32.mrf.mxu0  ;;  %1159 = vpow2.f32 %v960_v44 }
 0x108   : > { %v964_v49 = vmul.f32 -1.442695, %v525_v45  ;;  %v524_v50 = vadd.f32 %v508_v36, %v1523_v47  ;;  %v1318_v45 = vmov 0.0  }
 0x109   : > { %1043 = vmatprep.subr.mxu1 %v1318_v45  ;;  %1075 = vmatprep.mubr.msk.f32.mxu1 %vm1319_vm2, %v1318_v45 }
 0x10a   : > { %v963_v52 = vmul.f32 -1.442695, %v524_v50  ;;  %1161 = vpow2.f32 %v964_v49 }
 0x10b   : > { %1163 = vpow2.f32 %v961_v48 }
 0x10c   : > { %1165 = vpow2.f32 %v963_v52 }
 0x10d   : > { %1167 = vpow2.f32 %v958_v54 }
 0x10e   : > { %1169 = vpow2.f32 %v959_v56 }
 0x10f   : > { %1171 = vpow2.f32 %v956_v58 }
 0x110   : > { %1173 = vpow2.f32 %v957_v60 }
 0x111   : > { %1175 = vpow2.f32 %v954_v62 }
 0x113   : > { %v1158_v63 = vpop.eup %1157 }
 0x114   : > { %v587_v2 = vadd.f32 1.0, %v1158_v63  ;;  %v1160_v5 = vpop.eup %1159 }
 0x115   : > { %v585_v13 = vadd.f32 1.0, %v1160_v5 }
 0x116   : > { %1177 = vrcp.f32 %v587_v2 }
 0x117   : > { %v1162_v6 = vpop.eup %1161  ;;  %1179 = vpow2.f32 %v955_v1 }
 0x118   : > { %v1164_v9 = vpop.eup %1163  ;;  %v589_v10 = vadd.f32 1.0, %v1162_v6  ;;  %1181 = vpow2.f32 %v952_v4 }
 0x119   : > { %v1166_v11 = vpop.eup %1165  ;;  %v586_v18 = vadd.f32 1.0, %v1164_v9 }
 0x11a   : > { %1183 = vrcp.f32 %v589_v10  ;;  %v588_v14 = vadd.f32 1.0, %v1166_v11  ;;  %v1168_v15 = vpop.eup %1167  ;;  %v1541_v10 = vld [vmem:[%s1651_s3] ss:$0 sm:$0xff] }
 0x11b   : > { %1185 = vpow2.f32 %v953_v8  ;;  %v1170_v19 = vpop.eup %1169  ;;  %v583_v20 = vadd.f32 1.0, %v1168_v15 }
 0x11c   : > { %1187 = vrcp.f32 %v588_v14  ;;  %v1172_v21 = vpop.eup %1171  ;;  %v584_v23 = vadd.f32 1.0, %v1170_v19  ;;  %v643_v14 = vadd.f32 %v1541_v10, %v1523_v47  ;;  %v640_v47 = vadd.f32 %v1508_v34, %v1541_v10 }
 0x11d   : > { %1189 = vpow2.f32 %v950_v12  ;;  %v1174_v38 = vpop.eup %1173  ;;  %v581_v41 = vadd.f32 1.0, %v1172_v21  ;;  %v644_v12 = vadd.f32 %v1519_v43, %v1541_v10  ;;  %v637_v34 = vadd.f32 %v1541_v10, %v1506_v33 }
 0x11e   : > { %1191 = vrcp.f32 %v585_v13  ;;  %v1176_v39 = vpop.eup %1175  ;;  %v582_v36 = vadd.f32 1.0, %v1174_v38 }
 0x11f   : > { %1193 = vpow2.f32 %v951_v17  ;;  %v579_v48 = vadd.f32 1.0, %v1176_v39  ;;  %v642_v17 = vadd.f32 %v1512_v37, %v1541_v10  ;;  %v639_v37 = vadd.f32 %v1541_v10, %v1510_v35 }
 0x120   : > { %1195 = vrcp.f32 %v586_v18  ;;  %v638_v39 = vadd.f32 %v1504_v32, %v1541_v10  ;;  %v635_v32 = vadd.f32 %v1541_v10, %v1502_v31 }
 0x121   : > { %1197 = vrcp.f32 %v583_v20  ;;  %v641_v20 = vadd.f32 %v1541_v10, %v1516_v40 }
 0x122   : > { %1199 = vpow2.f32 %v949_v22 }
 0x123   : > { %v1178_v42 = vpop.eup %1177  ;;  %1201 = vrcp.f32 %v584_v23 }
 0x124   : > { %712 = vperm.xlu1 %1156, %v1178_v42   ;;  %v1180_v44 = vpop.eup %1179  ;;  %1203 = vrcp.f32 %v581_v41 }
 0x125   : > { %v1182_v46 = vpop.eup %1181  ;;  %v580_v51 = vadd.f32 1.0, %v1180_v44  ;;  %1205 = vrcp.f32 %v582_v36  ;;  %v636_v44 = vadd.f32 %v1500_v30, %v1541_v10  ;;  %v633_v30 = vadd.f32 %v1541_v10, %v1498_v29 }
 0x126   : > { %v577_v54 = vadd.f32 1.0, %v1182_v46  ;;  %1207 = vrcp.f32 %v579_v48 }
 0x127   : > { %v1184_v49 = vpop.eup %1183  ;;  %1209 = vrcp.f32 %v580_v51 }
 0x128   : > { %v1186_v50 = vpop.eup %1185  ;;  %722 = vperm.xlu0 %1155, %v1184_v49   ;;  %1211 = vrcp.f32 %v577_v54  ;;  %v632_v54 = vadd.f32 %v1492_v26, %v1541_v10 }
 0x129   : > { %v1188_v52 = vpop.eup %1187  ;;  %v578_v57 = vadd.f32 1.0, %v1186_v50  ;;  %v634_v50 = vadd.f32 %v1496_v28, %v1541_v10  ;;  %v741_v28 = vlaneseq }
 0x12a   : > { %v1190_v53 = vpop.eup %1189  ;;  %717 = vperm.xlu1 %1156, %v1188_v52  }
 0x12b   : > { %v1192_v55 = vpop.eup %1191  ;;  %v575_v59 = vadd.f32 1.0, %v1190_v53  ;;  %1213 = vrcp.f32 %v578_v57  ;;  %v742_v26 = vshrl.u32 %v741_v28, 7 }
 0x12c   : > { %v1194_v56 = vpop.eup %1193  ;;  %702 = vperm.xlu0 %1155, %v1192_v55  }
 0x12d   : > { %v1196_v58 = vpop.eup %1195  ;;  %v576_v62 = vadd.f32 1.0, %v1194_v56  ;;  %1215 = vrcp.f32 %v575_v59  ;;  %v631_v56 = vadd.f32 %v1541_v10, %v1494_v27  ;;  %v630_v59 = vadd.f32 %v1488_v24, %v1541_v10 }
 0x12e   : > { %707 = vperm.xlu1 %1156, %v1196_v58   ;;  %v1198_v60 = vpop.eup %1197  ;;  %v629_v27 = vadd.f32 %v1541_v10, %v1490_v25  ;;  %v1320_v24 = vmov 1.0  }
 0x12f   : > { %v1200_v61 = vpop.eup %1199  ;;  %1217 = vrcp.f32 %v576_v62 }
 0x130   : > { %692 = vperm.xlu0 %1155, %v1198_v60   ;;  %v1202_v63 = vpop.eup %1201  ;;  %v574_v1 = vadd.f32 1.0, %v1200_v61  ;;  %v966_v61 = vld [vmem:[%s278_s18] ss:$0 sm:$0xff] }
 0x131   : > { %v1204_v0 = vpop.eup %1203  ;;  %vm748_vm3 = vcmp.eq.s32.totalorder %v966_v61, %v742_v26 }
 0x132   : > { %697 = vperm.xlu1 %1156, %v1202_v63   ;;  %v1206_v2 = vpop.eup %1205  ;;  %1219 = vrcp.f32 %v574_v1  ;;  %v751_v1 = vld [vmem:[#allocation2] sm:$0xff] }
 0x133   : > { %v1208_v3 = vpop.eup %1207 }
 0x134   : > { %682 = vperm.xlu0 %1155, %v1204_v0   ;;  %v1210_v4 = vpop.eup %1209 }
 0x135   : > { %v1212_v5 = vpop.eup %1211 }
 0x136   : > { %687 = vperm.xlu1 %1156, %v1206_v2  }
 0x138   : > { %672 = vperm.xlu0 %1155, %v1208_v3   ;;  %v1214_v6 = vpop.eup %1213 }
 0x13a   : > { %677 = vperm.xlu1 %1156, %v1210_v4   ;;  %v1216_v7 = vpop.eup %1215 }
 0x13c   : > { %662 = vperm.xlu0 %1155, %v1212_v5   ;;  %v1218_v8 = vpop.eup %1217 }
 0x13e   : > { %667 = vperm.xlu1 %1156, %v1214_v6  }
 0x13f   : > { %v1220_v9 = vpop.eup %1219 }
 0x140   : > { %652 = vperm.xlu0 %1155, %v1216_v7  }
 0x142   : > { %657 = vperm.xlu1 %1156, %v1218_v8  }
 0x146   : > { %647 = vperm.xlu1 %1156, %v1220_v9  }
 0x19f   : > { %v713_v11 = vpop.permute.xlu1 %712 }
 0x1a0   : > { %v738_v21 = vmul.f32 %v713_v11, %v642_v17 }
 0x1a3   : > { %v723_v13 = vpop.permute.xlu0 %722 }
 0x1a4   : > { %v740_v15 = vmul.f32 %v723_v13, %v644_v12 }
 0x1a5   : > { %v718_v16 = vpop.permute.xlu1 %717 }
 0x1a6   : > { %v739_v18 = vmul.f32 %v718_v16, %v643_v14  ;;  %1044 = vmatpush3.msra.mxu1 %v740_v15 }
 0x1a7   : > { %1045 = vmatprep.subr.mxu1 %v1318_v45  ;;  %v703_v19 = vpop.permute.xlu0 %702 }
 0x1a8   : > { %1046 = vmatpush3.msra.mxu1 %v739_v18  ;;  %v736_v38 = vmul.f32 %v703_v19, %v640_v47 }
 0x1a9   : > { %1047 = vmatprep.subr.mxu1 %v1318_v45  ;;  %v708_v43 = vpop.permute.xlu1 %707 }
 0x1aa   : > { %v737_v22 = vmul.f32 %v708_v43, %v641_v20  ;;  %1048 = vmatpush3.msra.mxu1 %v738_v21 }
 0x1ab   : > { %v693_v23 = vpop.permute.xlu0 %692  ;;  %1049 = vmatprep.subr.mxu1 %v1318_v45 }
 0x1ac   : > { %1050 = vmatpush3.msra.mxu1 %v737_v22  ;;  %v734_v36 = vmul.f32 %v693_v23, %v638_v39 }
 0x1ad   : > { %1051 = vmatprep.subr.mxu1 %v1318_v45  ;;  %v698_v40 = vpop.permute.xlu1 %697 }
 0x1ae   : > { %v735_v41 = vmul.f32 %v698_v40, %v639_v37  ;;  %1052 = vmatpush3.msra.mxu1 %v736_v38 }
 0x1af   : > { %v683_v42 = vpop.permute.xlu0 %682  ;;  %1053 = vmatprep.subr.mxu1 %v1318_v45 }
 0x1b0   : > { %1054 = vmatpush3.msra.mxu1 %v735_v41  ;;  %v732_v49 = vmul.f32 %v683_v42, %v636_v44 }
 0x1b1   : > { %1055 = vmatprep.subr.mxu1 %v1318_v45  ;;  %v688_v35 = vpop.permute.xlu1 %687 }
 0x1b2   : > { %v733_v46 = vmul.f32 %v688_v35, %v637_v34  ;;  %1056 = vmatpush3.msra.mxu1 %v734_v36 }
 0x1b3   : > { %v673_v48 = vpop.permute.xlu0 %672  ;;  %1057 = vmatprep.subr.mxu1 %v1318_v45 }
 0x1b4   : > { %1058 = vmatpush3.msra.mxu1 %v733_v46  ;;  %v730_v53 = vmul.f32 %v673_v48, %v634_v50 }
 0x1b5   : > { %1059 = vmatprep.subr.mxu1 %v1318_v45  ;;  %v678_v33 = vpop.permute.xlu1 %677 }
 0x1b6   : > { %v731_v51 = vmul.f32 %v678_v33, %v635_v32  ;;  %1060 = vmatpush3.msra.mxu1 %v732_v49 }
 0x1b7   : > { %v663_v52 = vpop.permute.xlu0 %662  ;;  %1061 = vmatprep.subr.mxu1 %v1318_v45 }
 0x1b8   : > { %1062 = vmatpush3.msra.mxu1 %v731_v51  ;;  %v728_v57 = vmul.f32 %v663_v52, %v632_v54 }
 0x1b9   : > { %1063 = vmatprep.subr.mxu1 %v1318_v45  ;;  %v668_v31 = vpop.permute.xlu1 %667 }
 0x1ba   : > { %v729_v55 = vmul.f32 %v668_v31, %v633_v30  ;;  %1064 = vmatpush3.msra.mxu1 %v730_v53 }
 0x1bb   : > { %1065 = vmatprep.subr.mxu1 %v1318_v45  ;;  %v653_v29 = vpop.permute.xlu0 %652 }
 0x1bc   : > { %1066 = vmatpush3.msra.mxu1 %v729_v55  ;;  %v726_v62 = vmul.f32 %v653_v29, %v630_v59 }
 0x1bd   : > { %1067 = vmatprep.subr.mxu1 %v1318_v45  ;;  %v658_v58 = vpop.permute.xlu1 %657 }
 0x1be   : > { %v727_v60 = vmul.f32 %v658_v58, %v631_v56  ;;  %1068 = vmatpush3.msra.mxu1 %v728_v57 }
 0x1bf   : > { %1069 = vmatprep.subr.mxu1 %v1318_v45 }
 0x1c0   : > { %1070 = vmatpush3.msra.mxu1 %v727_v60 }
 0x1c1   : > { %1071 = vmatprep.subr.mxu1 %v1318_v45  ;;  %v648_v63 = vpop.permute.xlu1 %647 }
 0x1c2   : > { %v725_v0 = vmul.f32 %v648_v63, %v629_v27  ;;  %1072 = vmatpush3.msra.mxu1 %v726_v62 }
 0x1c3   : > { %1073 = vmatprep.subr.mxu1 %v1318_v45 }
 0x1c4   : > { %1074 = vmatpush3.msra.mxu1 %v725_v0 }
 0x1c5   : > { %1076 = vmatmul.mubr.msk.f32.vlgmr.msra.gmra.mxu1 %vm748_vm3, %v1320_v24 }
 0x284   : > { %827 = sbr.rel (%p969_p1) target bundleno = 657 (0x291), region = 48 }
 0x285   : > { %v818_v2 = vpop.f32.mrf.mxu1 }
 0x286   : > { %v822_v3 = vadd.f32 %v818_v2, %v751_v1 }
 0x287   : > { %v1077_v4 = vpop.f32.mrf.mxu1 }
 0x288   : > { %823 = vst.msk [vmem:[#allocation2] sm:$0xff] %vm307_vm1, %v822_v3 }
 0x28f   : > { %v828_v25 = vld [vmem:[#allocation2] sm:$0xff] }
 0x290   : > { %829 = vst.msk [vmem:[%s263_s9] sm:$0xff] %vm307_vm1, %v828_v25 }
 0x291 PF: > { %s971_s14 = sshll.u32 %s1301_s24, 7  ;;  %s844_s11 = sshll.u32 %s263_s9, 4  ;;  %s845_s11 = int_to_ptr.vmem [resolvable:$true] %s844_s11 }
 0x292   : > { %s842_s19 = scalar_lea.hbm %s1653_s5, %s971_s14  ;;  %s1657_s23 = sand.u32 1, %s1289_s21  }
 0x293   : > { %s831_s4 = scalar_lea.sflag [#allocation5], %s1657_s23  ;;  %s1221_s28 = scalar_lea.vmem %s845_s11, 128 }
 0x294   : > { %p1222_p2 = scmp.ne.s32.totalorder %s845_s11, %s1221_s28  ;;  %s1321_s8 = smov [#allocation4]  }
 0x295   : > { %s1225_s12 = sshll.u32 %s1321_s8, 4  ;;  %s1226_s12 = int_to_ptr.vmem [resolvable:$false] %s1225_s12 }
 0x296   : > { %p1223_p4 = pnand %p1222_p2, %p1404_p3  ;;  %s1227_s15 = scalar_lea.vmem %s1226_s12, 256 }
 0x297   : > { %p1228_p6 = scmp.lt.s32.totalorder %s845_s11, %s1226_s12  ;;  %p1229_p7 = scmp.lt.s32.totalorder %s1227_s15, %s1221_s28 }
 0x298   : > { %p1224_p5 = pneg %p1223_p4 }
 0x299   : > { %p1230_p8 = por %p1229_p7, %p1228_p6 }
 0x29b   : > { %p1231_p10 = pnand %p1230_p8, %p1224_p5 }
 0x29d   : > { %1234 = shalt.err (!%p1231_p10)
}
 0x29e   : > { %s1235_s24 = scalar_lea.hbm %s842_s19, 128  ;;  %s1239_s16 = scalar_lea.hbm %s1653_s5, 256 }
 0x29f   : > { %p1236_p11 = scmp.ne.s32.totalorder %s842_s19, %s1235_s24  ;;  %p1240_p0 = scmp.lt.s32.totalorder %s842_s19, %s1653_s5 }
 0x2a0   : > { %p1241_p1 = scmp.lt.s32.totalorder %s1239_s16, %s1235_s24 }
 0x2a1   : > { %p1237_p12 = pnand %p1236_p11, %p1404_p3 }
 0x2a2   : > { %p1242_p2 = por %p1241_p1, %p1240_p0 }
 0x2a3   : > { %p1238_p13 = pneg %p1237_p12 }
 0x2a5   : > { %p1243_p4 = pnand %p1242_p2, %p1238_p13 }
 0x2a7   : > { %1246 = shalt.err (!%p1243_p4)
}
 0x2a8   : > { %1078 = dma.vmem_to_hbm [thread:$0]  (%p1404_p3), %s845_s11, 128, %s842_s19, %s831_s4  }
 0x2a9 PF: > { %p1084_p5 = scmp.ge.s32.totalorder %s1313_s27, 2  ;;  %s856_s17 = sand.u32 1, %s1285_s20  }
 0x2aa   : > { %s857_s23 = scalar_lea.sflag [#allocation5], %s856_s17 }
 0x2ab   : > { %p1081_p6 = pnand %p1084_p5, %p1414_p9 }
 0x2ad   : > { %p1082_p7 = pneg %p1081_p6 }
 0x2af   : > { %1280 = dma.done.wait (%p1082_p7), %s857_s23, 128  }
 0x2b0   : > { %1282 = vsyncadd (%p1082_p7), %s857_s23, 4294967168  ;;  %s20_s27 = sadd.s32 1, %s1313_s27   ;;  %s1658_s20 = smov %s1289_s21 }
 0x2b1   : > { %p17_p8 = scmp.ge.s32.totalorder %s20_s27, 8   ;;  %s1659_s21 = smov %s1293_s22 }
 0x2b2   : > { %s1660_s22 = smov %s1422_s10  ;;  %s1661_s23 = smov %s1305_s25 }
 0x2b3   : > { %s1662_s24 = smov %s1309_s26  ;;  %s1663_s25 = smov %s1666_s29 }
 0x2b4   : > { %s1664_s26 = smov %s1670_s30  ;;  %19 = sbr.rel (!%p17_p8) target bundleno = 8 (0x8), region = 86 }
 0x2b9   :  { %862 = vsyncpa [#allocation5], 1 }
 0x2ba   :  { %864 = vsyncpa [#allocation5 + $0x1], 1 }

</bundles_post_ra>
